<compile_context>
chip_gen: v5e
topology: v5e:2x2
jax: 0.10.0
libtpu: 0.0.40
codegen_flags: <defaults>
</compile_context>

<pallas_src>
import math

import jax
import jax.numpy as jnp
from jax.experimental import pallas as pl
from jax.experimental.pallas import tpu as pltpu


def softmax_pooling_kernel(x_ref, o_ref):
    # x_ref: (tb, C, L) input tile; o_ref: (1, tb*C) lane-dense output tile.
    tb, C, L = x_ref.shape
    x = x_ref[...].astype(jnp.float32).reshape(tb * C, L)   # f32 compute
    xt = x.T                                                 # (L, tb*C): XLU transpose, lane-dense
    m = jnp.max(xt, axis=0, keepdims=True)                   # (1, tb*C) sublane reduce
    t = xt - m                                               # x/xt live range ends here
    e = jnp.exp(t)                                           # EUP, fully packed vregs
    num = jnp.sum(t * e, axis=0, keepdims=True)              # (1, tb*C)
    den = jnp.sum(e, axis=0, keepdims=True)                  # (1, tb*C), >= 1
    # Exact divide (correctness fix): pooled = m + sum(t*e)/sum(e)
    #                               = sum(x * softmax(x, -1), -1)
    pooled = m + num / den
    o_ref[...] = pooled.astype(o_ref.dtype)


def _round_up(x, m):
    return ((x + m - 1) // m) * m


def _choose_block_batch(B, C, L, itemsize, target_padded_bytes=2 << 20):
    """Pick tb (batch rows per block).

    Legality: B % tb == 0 (exact grid), and the (1, tb*C) output block needs
    tb*C to be a multiple of 128 (or tb == B, i.e. full-array block).
    Sizing uses the PADDED VMEM footprint of one input block row:
    round_up(C, 8) sublanes x round_up(L, 128) lanes x 4 B (f32 compute),
    i.e. ~8 KiB/row for (C=16, L=14), not the ~0.9 KiB of logical data.
    2 MiB/buffer => ~4 MiB double-buffered input + ~3 MiB in-kernel f32
    temporaries, comfortably inside every generation's default scoped VMEM.
    """
    per_b = _round_up(C, 8) * _round_up(L, 128) * max(itemsize, 4)
    want = max(1, target_padded_bytes // per_b)
    if B >= 16:
        want = min(want, B // 2)          # guarantee >= 2 grid steps (v7x 2 TCs)
    if want >= B:
        return B                          # tiny problem: single full-array block
    step = 128 // math.gcd(128, C)        # tb*C must be a multiple of 128
    tb = (min(want, B) // step) * step
    while tb >= step:
        if B % tb == 0:
            return tb
        tb -= step
    return B                              # fallback (e.g. awkward B): full batch


def softmax_pooling_ref(x):
    """Pure-JAX reference mirroring the PyTorch forward."""
    xf = x.astype(jnp.float32)
    p = jax.nn.softmax(xf, axis=-1)
    return jnp.sum(xf * p, axis=-1).astype(x.dtype)


def softmax_pooling(x, *, min_pallas_bytes=32 << 10):
    """x: (B, C, L) -> (B, C); identical to (x * x.softmax(-1)).sum(-1)."""
    B, C, L = x.shape
    itemsize = x.dtype.itemsize
    if B * C * L * itemsize < min_pallas_bytes:
        # Sub-VMEM-sized input: the fixed Pallas launch/pipeline cost dominates;
        # let XLA fuse the pooling with the Conv1d producer instead.
        return softmax_pooling_ref(x)

    tb = _choose_block_batch(B, C, L, itemsize)
    cost = pl.CostEstimate(
        flops=6 * B * C * L,                 # sub, mul, max/sum reductions, add (approx)
        transcendentals=B * C * L,           # exp
        bytes_accessed=B * C * L * itemsize + B * C * itemsize,
    )
    out_flat = pl.pallas_call(
        softmax_pooling_kernel,
        out_shape=jax.ShapeDtypeStruct((1, B * C), x.dtype),
        grid_spec=pltpu.PrefetchScalarGridSpec(
            num_scalar_prefetch=0,
            grid=(B // tb,),
            in_specs=[pl.BlockSpec((tb, C, L), lambda b: (b, 0, 0))],
            out_specs=pl.BlockSpec((1, tb * C), lambda b: (0, b)),
        ),
        compiler_params=pltpu.CompilerParams(
            # Batch-block axis is embarrassingly parallel; with >= 2 grid steps
            # it shards across both v7x TensorCores / the v6e megacore.
            dimension_semantics=("parallel",),
        ),
        cost_estimate=cost,
    )(x)
    return out_flat.reshape(B, C)            # metadata-only reshape of contiguous HBM


if __name__ == "__main__":
    key = jax.random.PRNGKey(0)
    k1, k2 = jax.random.split(key)

    # Shapes implied by the parent module: Conv1d(hid_size=8 -> 16, kernel=3)
    # on seq_len=16 -> (B, C, L) = (2, 16, 14).
    B_small, C, L = 2, 16, 14
    x_small = jax.random.normal(k1, (B_small, C, L), dtype=jnp.float32)
    out_small = jax.block_until_ready(softmax_pooling(x_small))
    ref_small = softmax_pooling_ref(x_small)
    assert out_small.shape == (B_small, C), f"bad shape {out_small.shape}"
    assert jnp.allclose(out_small, ref_small, atol=1e-5, rtol=1e-5), "small-case mismatch"

    # Larger batch that exercises the Pallas path (>= 2 grid steps).
    B_big = 128
    x_big = jax.random.normal(k2, (B_big, C, L), dtype=jnp.float32)
    out_big = jax.block_until_ready(softmax_pooling(x_big))
    ref_big = softmax_pooling_ref(x_big)
    assert out_big.shape == (B_big, C), f"bad shape {out_big.shape}"
    assert jnp.allclose(out_big, ref_big, atol=1e-5, rtol=1e-5), "pallas-case mismatch"

    print("KERNEL_OK")
</pallas_src>

<mosaic_0001>
module attributes {stable_mosaic.version = 11 : i64} {
  func.func @softmax_pooling_kernel(%arg0: i32, %arg1: memref<64x16x14xf32, #tpu.memory_space<vmem>>, %arg2: memref<1x1024xf32, #tpu.memory_space<vmem>>) attributes {dimension_semantics = [#tpu.dimension_semantics<parallel>], iteration_bounds = array<i64: 2>, scalar_prefetch = 0 : i64, scratch_operands = 0 : i64, tpu.core_type = #tpu.core_type<tc>, window_params = [{transform_indices = @transform_0, window_bounds = array<i64: 64, 16, 14>}, {transform_indices = @transform_1, window_bounds = array<i64: 1, 1024>}]} {
    %c0 = arith.constant 0 : index
    %c0_0 = arith.constant 0 : index
    %c0_1 = arith.constant 0 : index
    %0 = vector.load %arg1[%c0, %c0_0, %c0_1] : memref<64x16x14xf32, #tpu.memory_space<vmem>>, vector<64x16x14xf32>
    %1 = vector.shape_cast %0 : vector<64x16x14xf32> to vector<1024x14xf32>
    %2 = tpu.transpose %1, [1, 0] : vector<1024x14xf32> -> vector<14x1024xf32>
    %cst = arith.constant dense<0xFF800000> : vector<1024xf32>
    %3 = vector.multi_reduction <maximumf>, %2, %cst [0] : vector<14x1024xf32> to vector<1024xf32>
    %4 = vector.shape_cast %3 : vector<1024xf32> to vector<1x1024xf32>
    %5 = vector.broadcast %4 : vector<1x1024xf32> to vector<14x1024xf32>
    %6 = arith.subf %2, %5 : vector<14x1024xf32>
    %7 = math.exp %6 : vector<14x1024xf32>
    %8 = arith.mulf %6, %7 : vector<14x1024xf32>
    %cst_2 = arith.constant dense<0.000000e+00> : vector<1024xf32>
    %9 = vector.multi_reduction <add>, %8, %cst_2 [0] : vector<14x1024xf32> to vector<1024xf32>
    %10 = vector.shape_cast %9 : vector<1024xf32> to vector<1x1024xf32>
    %cst_3 = arith.constant dense<0.000000e+00> : vector<1024xf32>
    %11 = vector.multi_reduction <add>, %7, %cst_3 [0] : vector<14x1024xf32> to vector<1024xf32>
    %12 = vector.shape_cast %11 : vector<1024xf32> to vector<1x1024xf32>
    %13 = arith.divf %10, %12 : vector<1x1024xf32>
    %14 = arith.addf %4, %13 : vector<1x1024xf32>
    %c0_4 = arith.constant 0 : index
    %c0_5 = arith.constant 0 : index
    %15 = vector.load %arg2[%c0_4, %c0_5] : memref<1x1024xf32, #tpu.memory_space<vmem>>, vector<1x1024xf32>
    tpu.vector_store %arg2[%c0_4, %c0_5], %14 {strides = array<i32>} : memref<1x1024xf32, #tpu.memory_space<vmem>>, vector<1x1024xf32>,
    return
  }
  func.func @transform_0(%arg0: i32) -> (i32, i32, i32) {
    %c0_i32 = arith.constant 0 : i32
    %c0_i32_0 = arith.constant 0 : i32
    %c0_i32_1 = arith.constant 0 : i32
    return %arg0, %c0_i32, %c0_i32_0 : i32, i32, i32
  }
  func.func @transform_1(%arg0: i32) -> (i32, i32) {
    %c0_i32 = arith.constant 0 : i32
    %c0_i32_0 = arith.constant 0 : i32
    return %c0_i32, %arg0 : i32, i32
  }
}

</mosaic_0001>

<bundles_post_ra>
// kernel: tpu_custom_call.1
= control target key start
LH: loop header
LB: loop body
LE: loop exit
PB: predicated region body
PF: predicated region fallthrough
CT: control target
= control target key end

     0   :  { %6 = vsyncpa [#allocation3], 0  ;;  %s1791_s0 = inlined_call_operand.vmem [shape: f32[128,16,14], index: 0, kind: input, shape index: {}]   ;;  %s1792_s1 = inlined_call_operand.hbm [shape: f32[1,2048], index: 1, kind: output, shape index: {}]  }
   0x1   :  { %8 = vsyncpa [#allocation3 + $0x1], 0  ;;  %s1170_s6 = smov 0   ;;  %s1172_s7 = smov 0  }
   0x2   :  { %s1174_s8 = smov 0   ;;  %s1176_s9 = smov 0  }
   0x3 LB: > { %s1191_s10 = sadd.s32 4294967295, %s1158_s9   ;;  %s996_s11 = sadd.s32 4294967294, %s1158_s9   ;;  %s1158_s9 = sphi %s1176_s9, %s1818_s9   ;;  %s1154_s8 = sphi %s1174_s8, %s1817_s8   ;;  %s1150_s7 = sphi %s1172_s7, %s1816_s7   ;;  %s1146_s6 = sphi %s1170_s6, %s1815_s6  }
   0x4   : > { %s1195_s12 = sadd.s32 1, %s1158_s9   ;;  %s47_s13 = sadd.s32 1, %s1154_s8 }
   0x5   : > { %s44_s14 = ssub.s32 %s1158_s9, %s1195_s12  ;;  %p57_p0 = scmp.ne.s32.totalorder %s1154_s8, %s1150_s7 }
   0x6   : > { %p45_p1 = scmp.eq.s32.totalorder %s44_s14, 0  ;;  %p58_p2 = scmp.eq.s32.totalorder %s1191_s10, 1 }
   0x7   : > { %p63_p3 = scmp.ne.s32.totalorder %s1150_s7, %s1146_s6  ;;  %p64_p4 = scmp.eq.s32.totalorder %s996_s11, 1 }
   0x8   : > { %s1206_s15 = scalar_select %p45_p1, %s1154_s8, %s47_s13  }
   0x9   : > { %p1208_p5 = por %p58_p2, %p57_p0  ;;  %p1212_p6 = por %p64_p4, %p63_p3 }
   0xa   : > { %p999_p7 = scmp.ge.s32.totalorder %s1158_s9, 1  ;;  %p92_p8 = scmp.lt.s32.totalorder %s1158_s9, 3 }
   0xc   : > { %p93_p9 = pnand %p999_p7, %p92_p8 }
   0xd   : > { %s1001_s18 = sshll.u32 (!%p93_p9), %s1191_s10, 6  ;;  %s110_s23 = sand.u32 (!%p93_p9), 1, %s1150_s7  }
   0xe   : > { %96 = sbr.rel (%p93_p9) target bundleno = 525 (0x20d), region = 24  ;;  %p114_p10 = scmp.lt.s32.totalorder (!%p93_p9), %s1001_s18, 127 }
   0xf   : > { %s1752_s24 = sshll.u32 (!%p93_p9), %s110_s23, 3  ;;  %s1005_s25 = sshll.u32 (!%p93_p9), %s1191_s10, 3 }
  0x10   : > { %s932_s28 = scalar_lea.hbm (!%p93_p9), %s1792_s1, %s1005_s25  ;;  %s112_s29 = scalar_lea.vmem (!%p93_p9), [#allocation2], %s1752_s24 }
  0x11   : > { %s934_s30 = sshll.u32 (!%p93_p9), %s112_s29, 4  ;;  %s936_s2 = sshll.u32 (!%p93_p9), %s932_s28, 4  ;;  %s935_s30 = int_to_ptr.vmem [resolvable:$true] %s934_s30  ;;  %s937_s2 = int_to_ptr.hbm [resolvable:$true] %s936_s2 }
  0x12   : > { %s922_s3 = scalar_lea.sflag (!%p93_p9), [#allocation3], %s110_s23  ;;  %s1110_s4 = sshra.s32 (!%p93_p9), %s937_s2, 4  ;;  %s1111_s4 = int_to_ptr.hbm [resolvable:$true] %s1110_s4 }
  0x13   : > { %s1820_s18 = smov (!%p114_p10, %s1001_s18), 127  ;;  %vm505_vm0 = vcmask 1045504   ;;  %s1112_s5 = scalar_lea.hbm %s1111_s4, 8 }
  0x14   : > { %s1008_s19 = sshll.u32 %s1820_s18, 4  ;;  %p1113_p11 = scmp.ne.s32.totalorder %s1111_s4, %s1112_s5 }
  0x15   : > { %s1222_s22 = scalar_lea.vmem %s1791_s0, %s1008_s19  ;;  %s1116_s13 = scalar_lea.hbm %s1792_s1, 16 }
  0x16   : > { %v137_v0 = vld [vmem:[%s1222_s22 + $0x80] sm:$0xff]  ;;  %v138_v2 = vld [vmem:[%s1222_s22 + $0x88] sm:$0xff]  ;;  %v139_v4 = vld [vmem:[%s1222_s22 + $0x90] sm:$0xff]  ;;  %p1114_p12 = pnand %p1113_p11, %p1208_p5  ;;  %p1117_p0 = scmp.lt.s32.totalorder %s1111_s4, %s1792_s1 }
  0x17   : > { %v121_v1 = vld [vmem:[%s1222_s22] sm:$0xff]  ;;  %281 = vxpose.xlu1.b32.start [1/16] (narrow) %v137_v0, 16  ;;  %v122_v3 = vld [vmem:[%s1222_s22 + $0x8] sm:$0xff]  ;;  %v123_v5 = vld [vmem:[%s1222_s22 + $0x10] sm:$0xff]  ;;  %p1118_p1 = scmp.lt.s32.totalorder %s1116_s13, %s1112_s5 }
  0x18   : > { %249 = vxpose.xlu0.b32.start [1/16] (narrow) %v121_v1, 16  ;;  %v140_v6 = vld [vmem:[%s1222_s22 + $0x98] sm:$0xff]  ;;  %v153_v8 = vld [vmem:[%s1222_s22 + $0x100] sm:$0xff]  ;;  %v154_v11 = vld [vmem:[%s1222_s22 + $0x108] sm:$0xff]  ;;  %p1115_p13 = pneg %p1114_p12 }
  0x19   : > { %v124_v7 = vld [vmem:[%s1222_s22 + $0x18] sm:$0xff]  ;;  %313 = vxpose.xlu2.b32.start [1/16] (narrow) %v153_v8, 16  ;;  %v141_v9 = vld [vmem:[%s1222_s22 + $0xa0] sm:$0xff]  ;;  %v142_v12 = vld [vmem:[%s1222_s22 + $0xa8] sm:$0xff]  ;;  %p1119_p2 = por %p1118_p1, %p1117_p0 }
  0x1a   : > { %v125_v10 = vld [vmem:[%s1222_s22 + $0x20] sm:$0xff]  ;;  %v126_v13 = vld [vmem:[%s1222_s22 + $0x28] sm:$0xff]  ;;  %v155_v14 = vld [vmem:[%s1222_s22 + $0x110] sm:$0xff] }
  0x1b   : > { %v143_v15 = vld [vmem:[%s1222_s22 + $0xb0] sm:$0xff]  ;;  %v156_v17 = vld [vmem:[%s1222_s22 + $0x118] sm:$0xff]  ;;  %v157_v20 = vld [vmem:[%s1222_s22 + $0x120] sm:$0xff]  ;;  %p1120_p3 = pnand %p1119_p2, %p1115_p13 }
  0x1c   : > { %v127_v16 = vld [vmem:[%s1222_s22 + $0x30] sm:$0xff]  ;;  %v144_v18 = vld [vmem:[%s1222_s22 + $0xb8] sm:$0xff]  ;;  %v145_v21 = vld [vmem:[%s1222_s22 + $0xc0] sm:$0xff] }
  0x1d   : > { %v128_v19 = vld [vmem:[%s1222_s22 + $0x38] sm:$0xff]  ;;  %v129_v22 = vld [vmem:[%s1222_s22 + $0x40] sm:$0xff]  ;;  %v158_v23 = vld [vmem:[%s1222_s22 + $0x128] sm:$0xff] }
  0x1e   : > { %v146_v24 = vld [vmem:[%s1222_s22 + $0xc8] sm:$0xff]  ;;  %v159_v26 = vld [vmem:[%s1222_s22 + $0x130] sm:$0xff]  ;;  %v160_v29 = vld [vmem:[%s1222_s22 + $0x138] sm:$0xff] }
  0x1f   : > { %282 = vxpose.xlu1.b32.cont [2/16] (narrow) %v138_v2, 16  ;;  %v130_v25 = vld [vmem:[%s1222_s22 + $0x48] sm:$0xff]  ;;  %v147_v27 = vld [vmem:[%s1222_s22 + $0xd0] sm:$0xff]  ;;  %v148_v30 = vld [vmem:[%s1222_s22 + $0xd8] sm:$0xff] }
  0x20   : > { %250 = vxpose.xlu0.b32.cont [2/16] (narrow) %v122_v3, 16  ;;  %v131_v28 = vld [vmem:[%s1222_s22 + $0x50] sm:$0xff]  ;;  %v132_v31 = vld [vmem:[%s1222_s22 + $0x58] sm:$0xff]  ;;  %v161_v32 = vld [vmem:[%s1222_s22 + $0x140] sm:$0xff] }
  0x21   : > { %314 = vxpose.xlu2.b32.cont [2/16] (narrow) %v154_v11, 16  ;;  %v149_v33 = vld [vmem:[%s1222_s22 + $0xe0] sm:$0xff]  ;;  %v162_v35 = vld [vmem:[%s1222_s22 + $0x148] sm:$0xff]  ;;  %v163_v38 = vld [vmem:[%s1222_s22 + $0x150] sm:$0xff] }
  0x22   : > { %v133_v34 = vld [vmem:[%s1222_s22 + $0x60] sm:$0xff]  ;;  %v150_v36 = vld [vmem:[%s1222_s22 + $0xe8] sm:$0xff]  ;;  %v151_v39 = vld [vmem:[%s1222_s22 + $0xf0] sm:$0xff] }
  0x23   : > { %v134_v37 = vld [vmem:[%s1222_s22 + $0x68] sm:$0xff]  ;;  %v135_v40 = vld [vmem:[%s1222_s22 + $0x70] sm:$0xff]  ;;  %v164_v41 = vld [vmem:[%s1222_s22 + $0x158] sm:$0xff] }
  0x24   : > { %v152_v42 = vld [vmem:[%s1222_s22 + $0xf8] sm:$0xff]  ;;  %v165_v44 = vld [vmem:[%s1222_s22 + $0x160] sm:$0xff]  ;;  %v166_v47 = vld [vmem:[%s1222_s22 + $0x168] sm:$0xff] }
  0x25   : > { %v136_v43 = vld [vmem:[%s1222_s22 + $0x78] sm:$0xff]  ;;  %v185_v45 = vld [vmem:[%s1222_s22 + $0x200] sm:$0xff]  ;;  %v186_v48 = vld [vmem:[%s1222_s22 + $0x208] sm:$0xff] }
  0x26   : > { %v169_v46 = vld [vmem:[%s1222_s22 + $0x180] sm:$0xff]  ;;  %v170_v49 = vld [vmem:[%s1222_s22 + $0x188] sm:$0xff]  ;;  %v167_v50 = vld [vmem:[%s1222_s22 + $0x170] sm:$0xff] }
  0x27   : > { %283 = vxpose.xlu1.b32.cont [3/16] (narrow) %v139_v4, 16  ;;  %v187_v51 = vld [vmem:[%s1222_s22 + $0x210] sm:$0xff]  ;;  %v168_v53 = vld [vmem:[%s1222_s22 + $0x178] sm:$0xff]  ;;  %v201_v56 = vld [vmem:[%s1222_s22 + $0x280] sm:$0xff] }
  0x28   : > { %251 = vxpose.xlu0.b32.cont [3/16] (narrow) %v123_v5, 16  ;;  %v171_v52 = vld [vmem:[%s1222_s22 + $0x190] sm:$0xff]  ;;  %v188_v54 = vld [vmem:[%s1222_s22 + $0x218] sm:$0xff]  ;;  %v189_v57 = vld [vmem:[%s1222_s22 + $0x220] sm:$0xff] }
  0x29   : > { %315 = vxpose.xlu2.b32.cont [3/16] (narrow) %v155_v14, 16  ;;  %v172_v55 = vld [vmem:[%s1222_s22 + $0x198] sm:$0xff]  ;;  %v173_v58 = vld [vmem:[%s1222_s22 + $0x1a0] sm:$0xff]  ;;  %v202_v59 = vld [vmem:[%s1222_s22 + $0x288] sm:$0xff] }
  0x2a   : > { %v190_v60 = vld [vmem:[%s1222_s22 + $0x228] sm:$0xff]  ;;  %v203_v62 = vld [vmem:[%s1222_s22 + $0x290] sm:$0xff]  ;;  %v204_v1 = vld [vmem:[%s1222_s22 + $0x298] sm:$0xff] }
  0x2b   : > { %v174_v61 = vld [vmem:[%s1222_s22 + $0x1a8] sm:$0xff]  ;;  %v191_v63 = vld [vmem:[%s1222_s22 + $0x230] sm:$0xff]  ;;  %v192_v2 = vld [vmem:[%s1222_s22 + $0x238] sm:$0xff] }
  0x2c   : > { %v175_v0 = vld [vmem:[%s1222_s22 + $0x1b0] sm:$0xff]  ;;  %v176_v3 = vld [vmem:[%s1222_s22 + $0x1b8] sm:$0xff]  ;;  %v205_v4 = vld [vmem:[%s1222_s22 + $0x2a0] sm:$0xff] }
  0x2d   : > { %v193_v5 = vld [vmem:[%s1222_s22 + $0x240] sm:$0xff]  ;;  %v194_v8 = vld [vmem:[%s1222_s22 + $0x248] sm:$0xff]  ;;  %v195_v11 = vld [vmem:[%s1222_s22 + $0x250] sm:$0xff] }
  0x2e   : > { %v196_v14 = vld [vmem:[%s1222_s22 + $0x258] sm:$0xff] }
  0x2f   : > { %284 = vxpose.xlu1.b32.cont [4/16] (narrow) %v140_v6, 16  ;;  %v177_v6 = vld [vmem:[%s1222_s22 + $0x1c0] sm:$0xff] }
  0x30   : > { %252 = vxpose.xlu0.b32.cont [4/16] (narrow) %v124_v7, 16  ;;  %v206_v7 = vld [vmem:[%s1222_s22 + $0x2a8] sm:$0xff] }
  0x31   : > { %316 = vxpose.xlu2.b32.cont [4/16] (narrow) %v156_v17, 16  ;;  %v197_v17 = vld [vmem:[%s1222_s22 + $0x260] sm:$0xff] }
  0x37   : > { %285 = vxpose.xlu1.b32.cont [5/16] (narrow) %v141_v9, 16  ;;  %v178_v9 = vld [vmem:[%s1222_s22 + $0x1c8] sm:$0xff] }
  0x38   : > { %253 = vxpose.xlu0.b32.cont [5/16] (narrow) %v125_v10, 16  ;;  %v207_v10 = vld [vmem:[%s1222_s22 + $0x2b0] sm:$0xff] }
  0x39   : > { %317 = vxpose.xlu2.b32.cont [5/16] (narrow) %v157_v20, 16  ;;  %v198_v20 = vld [vmem:[%s1222_s22 + $0x268] sm:$0xff] }
  0x3f   : > { %286 = vxpose.xlu1.b32.cont [6/16] (narrow) %v142_v12, 16  ;;  %v179_v12 = vld [vmem:[%s1222_s22 + $0x1d0] sm:$0xff] }
  0x40   : > { %254 = vxpose.xlu0.b32.cont [6/16] (narrow) %v126_v13, 16  ;;  %v208_v13 = vld [vmem:[%s1222_s22 + $0x2b8] sm:$0xff] }
  0x41   : > { %318 = vxpose.xlu2.b32.cont [6/16] (narrow) %v158_v23, 16  ;;  %v199_v23 = vld [vmem:[%s1222_s22 + $0x270] sm:$0xff] }
  0x47   : > { %287 = vxpose.xlu1.b32.cont [7/16] (narrow) %v143_v15, 16  ;;  %v180_v15 = vld [vmem:[%s1222_s22 + $0x1d8] sm:$0xff] }
  0x48   : > { %255 = vxpose.xlu0.b32.cont [7/16] (narrow) %v127_v16, 16  ;;  %v209_v16 = vld [vmem:[%s1222_s22 + $0x2c0] sm:$0xff] }
  0x49   : > { %319 = vxpose.xlu2.b32.cont [7/16] (narrow) %v159_v26, 16  ;;  %v200_v26 = vld [vmem:[%s1222_s22 + $0x278] sm:$0xff] }
  0x4f   : > { %288 = vxpose.xlu1.b32.cont [8/16] (narrow) %v144_v18, 16  ;;  %v181_v18 = vld [vmem:[%s1222_s22 + $0x1e0] sm:$0xff] }
  0x50   : > { %256 = vxpose.xlu0.b32.cont [8/16] (narrow) %v128_v19, 16  ;;  %v210_v19 = vld [vmem:[%s1222_s22 + $0x2c8] sm:$0xff] }
  0x51   : > { %320 = vxpose.xlu2.b32.cont [8/16] (narrow) %v160_v29, 16  ;;  %v233_v29 = vld [vmem:[%s1222_s22 + $0x380] sm:$0xff] }
  0x57   : > { %289 = vxpose.xlu1.b32.cont [9/16] (narrow) %v145_v21, 16  ;;  %v182_v21 = vld [vmem:[%s1222_s22 + $0x1e8] sm:$0xff] }
  0x58   : > { %257 = vxpose.xlu0.b32.cont [9/16] (narrow) %v129_v22, 16  ;;  %v211_v22 = vld [vmem:[%s1222_s22 + $0x2d0] sm:$0xff] }
  0x59   : > { %321 = vxpose.xlu2.b32.cont [9/16] (narrow) %v161_v32, 16  ;;  %v234_v32 = vld [vmem:[%s1222_s22 + $0x388] sm:$0xff] }
  0x5f   : > { %290 = vxpose.xlu1.b32.cont [10/16] (narrow) %v146_v24, 16  ;;  %v183_v24 = vld [vmem:[%s1222_s22 + $0x1f0] sm:$0xff] }
  0x60   : > { %258 = vxpose.xlu0.b32.cont [10/16] (narrow) %v130_v25, 16  ;;  %v212_v25 = vld [vmem:[%s1222_s22 + $0x2d8] sm:$0xff] }
  0x61   : > { %322 = vxpose.xlu2.b32.cont [10/16] (narrow) %v162_v35, 16  ;;  %v235_v35 = vld [vmem:[%s1222_s22 + $0x390] sm:$0xff] }
  0x67   : > { %291 = vxpose.xlu1.b32.cont [11/16] (narrow) %v147_v27, 16  ;;  %v184_v27 = vld [vmem:[%s1222_s22 + $0x1f8] sm:$0xff] }
  0x68   : > { %259 = vxpose.xlu0.b32.cont [11/16] (narrow) %v131_v28, 16  ;;  %v213_v28 = vld [vmem:[%s1222_s22 + $0x2e0] sm:$0xff] }
  0x69   : > { %323 = vxpose.xlu2.b32.cont [11/16] (narrow) %v163_v38, 16  ;;  %v236_v38 = vld [vmem:[%s1222_s22 + $0x398] sm:$0xff] }
  0x6f   : > { %292 = vxpose.xlu1.b32.cont [12/16] (narrow) %v148_v30, 16  ;;  %v217_v30 = vld [vmem:[%s1222_s22 + $0x300] sm:$0xff] }
  0x70   : > { %260 = vxpose.xlu0.b32.cont [12/16] (narrow) %v132_v31, 16  ;;  %v214_v31 = vld [vmem:[%s1222_s22 + $0x2e8] sm:$0xff] }
  0x71   : > { %324 = vxpose.xlu2.b32.cont [12/16] (narrow) %v164_v41, 16  ;;  %v221_v41 = vld [vmem:[%s1222_s22 + $0x320] sm:$0xff] }
  0x77   : > { %293 = vxpose.xlu1.b32.cont [13/16] (narrow) %v149_v33, 16  ;;  %v218_v33 = vld [vmem:[%s1222_s22 + $0x308] sm:$0xff] }
  0x78   : > { %261 = vxpose.xlu0.b32.cont [13/16] (narrow) %v133_v34, 16  ;;  %v215_v34 = vld [vmem:[%s1222_s22 + $0x2f0] sm:$0xff] }
  0x79   : > { %325 = vxpose.xlu2.b32.cont [13/16] (narrow) %v165_v44, 16  ;;  %v239_v44 = vld [vmem:[%s1222_s22 + $0x3b0] sm:$0xff] }
  0x7f   : > { %294 = vxpose.xlu1.b32.cont [14/16] (narrow) %v150_v36, 16  ;;  %v219_v36 = vld [vmem:[%s1222_s22 + $0x310] sm:$0xff] }
  0x80   : > { %262 = vxpose.xlu0.b32.cont [14/16] (narrow) %v134_v37, 16  ;;  %v216_v37 = vld [vmem:[%s1222_s22 + $0x2f8] sm:$0xff] }
  0x81   : > { %326 = vxpose.xlu2.b32.cont [14/16] (narrow) %v166_v47, 16  ;;  %v224_v47 = vld [vmem:[%s1222_s22 + $0x338] sm:$0xff] }
  0x87   : > { %295 = vxpose.xlu1.b32.cont [15/16] (narrow) %v151_v39, 16  ;;  %v220_v39 = vld [vmem:[%s1222_s22 + $0x318] sm:$0xff] }
  0x88   : > { %263 = vxpose.xlu0.b32.cont [15/16] (narrow) %v135_v40, 16  ;;  %v237_v40 = vld [vmem:[%s1222_s22 + $0x3a0] sm:$0xff] }
  0x89   : > { %327 = vxpose.xlu2.b32.cont [15/16] (narrow) %v167_v50, 16  ;;  %v242_v50 = vld [vmem:[%s1222_s22 + $0x3c8] sm:$0xff] }
  0x8f   : > { %296 = vxpose.xlu1.b32.end [16/16] (narrow) %v152_v42, 16  ;;  %v238_v42 = vld [vmem:[%s1222_s22 + $0x3a8] sm:$0xff] }
  0x90   : > { %264 = vxpose.xlu0.b32.end [16/16] (narrow) %v136_v43, 16  ;;  %v222_v43 = vld [vmem:[%s1222_s22 + $0x328] sm:$0xff] }
  0x91   : > { %328 = vxpose.xlu2.b32.end [16/16] (narrow) %v168_v53, 16  ;;  %v227_v53 = vld [vmem:[%s1222_s22 + $0x350] sm:$0xff] }
  0x97   : > { %377 = vxpose.xlu1.b32.start [1/16] (narrow) %v185_v45, 16  ;;  %v223_v45 = vld [vmem:[%s1222_s22 + $0x330] sm:$0xff] }
  0x98   : > { %345 = vxpose.xlu0.b32.start [1/16] (narrow) %v169_v46, 16  ;;  %v240_v46 = vld [vmem:[%s1222_s22 + $0x3b8] sm:$0xff] }
  0x99   : > { %409 = vxpose.xlu2.b32.start [1/16] (narrow) %v201_v56, 16 }
  0x9f   : > { %378 = vxpose.xlu1.b32.cont [2/16] (narrow) %v186_v48, 16  ;;  %v241_v48 = vld [vmem:[%s1222_s22 + $0x3c0] sm:$0xff] }
  0xa0   : > { %346 = vxpose.xlu0.b32.cont [2/16] (narrow) %v170_v49, 16  ;;  %v225_v49 = vld [vmem:[%s1222_s22 + $0x340] sm:$0xff] }
  0xa1   : > { %410 = vxpose.xlu2.b32.cont [2/16] (narrow) %v202_v59, 16 }
  0xa7   : > { %379 = vxpose.xlu1.b32.cont [3/16] (narrow) %v187_v51, 16  ;;  %v226_v51 = vld [vmem:[%s1222_s22 + $0x348] sm:$0xff] }
  0xa8   : > { %347 = vxpose.xlu0.b32.cont [3/16] (narrow) %v171_v52, 16  ;;  %v243_v52 = vld [vmem:[%s1222_s22 + $0x3d0] sm:$0xff] }
  0xa9   : > { %411 = vxpose.xlu2.b32.cont [3/16] (narrow) %v203_v62, 16 }
  0xaf   : > { %380 = vxpose.xlu1.b32.cont [4/16] (narrow) %v188_v54, 16 }
  0xb0   : > { %348 = vxpose.xlu0.b32.cont [4/16] (narrow) %v172_v55, 16 }
  0xb1   : > { %412 = vxpose.xlu2.b32.cont [4/16] (narrow) %v204_v1, 16 }
  0xb2   : > { %v1342_v55 = vpop.trf.xlu2 }
  0xb7   : > { %381 = vxpose.xlu1.b32.cont [5/16] (narrow) %v189_v57, 16  ;;  %v244_v57 = vld [vmem:[%s1222_s22 + $0x3d8] sm:$0xff] }
  0xb8   : > { %349 = vxpose.xlu0.b32.cont [5/16] (narrow) %v173_v58, 16  ;;  %v228_v58 = vld [vmem:[%s1222_s22 + $0x358] sm:$0xff] }
  0xb9   : > { %413 = vxpose.xlu2.b32.cont [5/16] (narrow) %v205_v4, 16 }
  0xbb   : > { %v1344_v56 = vpop.trf.xlu1 }
  0xbc   : > { %v265_v54 = vpop.trf.xlu0 }
  0xbf   : > { %382 = vxpose.xlu1.b32.cont [6/16] (narrow) %v190_v60, 16 }
  0xc0   : > { %350 = vxpose.xlu0.b32.cont [6/16] (narrow) %v174_v61, 16  ;;  %v1349_v61 = vpop.trf.xlu2 }
  0xc1   : > { %414 = vxpose.xlu2.b32.cont [6/16] (narrow) %v206_v7, 16  ;;  %v230_v7 = vld [vmem:[%s1222_s22 + $0x368] sm:$0xff] }
  0xc3   : > { %v1353_v1 = vpop.trf.xlu1 }
  0xc4   : > { %v266_v59 = vpop.trf.xlu0 }
  0xc5   : > { %v506_v60 = vsel %vm505_vm0, %v266_v59, -inf }
  0xc6   : > { %v507_v62 = vmax.f32 %v265_v54, %v506_v60 }
  0xc7   : > { %383 = vxpose.xlu1.b32.cont [7/16] (narrow) %v191_v63, 16  ;;  %v245_v63 = vld [vmem:[%s1222_s22 + $0x3e0] sm:$0xff] }
  0xc8   : > { %351 = vxpose.xlu0.b32.cont [7/16] (narrow) %v175_v0, 16  ;;  %v229_v0 = vld [vmem:[%s1222_s22 + $0x360] sm:$0xff] }
  0xc9   : > { %415 = vxpose.xlu2.b32.cont [7/16] (narrow) %v207_v10, 16  ;;  %v522_v10 = vsel %vm505_vm0, %v1349_v61, -inf }
  0xcf   : > { %384 = vxpose.xlu1.b32.cont [8/16] (narrow) %v192_v2, 16  ;;  %v508_v2 = vrot.slane %v507_v62, 4 }
  0xd0   : > { %352 = vxpose.xlu0.b32.cont [8/16] (narrow) %v176_v3, 16 }
  0xd1   : > { %416 = vxpose.xlu2.b32.cont [8/16] (narrow) %v208_v13, 16  ;;  %v514_v13 = vsel %vm505_vm0, %v1353_v1, -inf }
  0xd7   : > { %385 = vxpose.xlu1.b32.cont [9/16] (narrow) %v193_v5, 16  ;;  %v509_v5 = vmax.f32 %v507_v62, %v508_v2 }
  0xd8   : > { %353 = vxpose.xlu0.b32.cont [9/16] (narrow) %v177_v6, 16  ;;  %v246_v6 = vld [vmem:[%s1222_s22 + $0x3e8] sm:$0xff] }
  0xd9   : > { %417 = vxpose.xlu2.b32.cont [9/16] (narrow) %v209_v16, 16  ;;  %v247_v16 = vld [vmem:[%s1222_s22 + $0x3f0] sm:$0xff] }
  0xdf   : > { %386 = vxpose.xlu1.b32.cont [10/16] (narrow) %v194_v8, 16 }
  0xe0   : > { %354 = vxpose.xlu0.b32.cont [10/16] (narrow) %v178_v9, 16  ;;  %v510_v9 = vrot.slane %v509_v5, 2 }
  0xe1   : > { %418 = vxpose.xlu2.b32.cont [10/16] (narrow) %v210_v19, 16  ;;  %v515_v19 = vmax.f32 %v1344_v56, %v514_v13 }
  0xe7   : > { %387 = vxpose.xlu1.b32.cont [11/16] (narrow) %v195_v11, 16  ;;  %v523_v11 = vmax.f32 %v1342_v55, %v522_v10 }
  0xe8   : > { %355 = vxpose.xlu0.b32.cont [11/16] (narrow) %v179_v12, 16  ;;  %v511_v12 = vmax.f32 %v509_v5, %v510_v9 }
  0xe9   : > { %419 = vxpose.xlu2.b32.cont [11/16] (narrow) %v211_v22, 16 }
  0xef   : > { %388 = vxpose.xlu1.b32.cont [12/16] (narrow) %v196_v14, 16 }
  0xf0   : > { %356 = vxpose.xlu0.b32.cont [12/16] (narrow) %v180_v15, 16 }
  0xf1   : > { %420 = vxpose.xlu2.b32.cont [12/16] (narrow) %v212_v25, 16 }
  0xf7   : > { %389 = vxpose.xlu1.b32.cont [13/16] (narrow) %v197_v17, 16  ;;  %v231_v17 = vld [vmem:[%s1222_s22 + $0x370] sm:$0xff] }
  0xf8   : > { %357 = vxpose.xlu0.b32.cont [13/16] (narrow) %v181_v18, 16  ;;  %v524_v18 = vrot.slane %v523_v11, 4 }
  0xf9   : > { %421 = vxpose.xlu2.b32.cont [13/16] (narrow) %v213_v28, 16 }
  0xfa   : > { %v525_v25 = vmax.f32 %v523_v11, %v524_v18 }
  0xff   : > { %390 = vxpose.xlu1.b32.cont [14/16] (narrow) %v198_v20, 16 }
 0x100   : > { %358 = vxpose.xlu0.b32.cont [14/16] (narrow) %v182_v21, 16  ;;  %v512_v21 = vrot.slane %v511_v12, 1 }
 0x101   : > { %422 = vxpose.xlu2.b32.cont [14/16] (narrow) %v214_v31, 16  ;;  %v232_v31 = vld [vmem:[%s1222_s22 + $0x378] sm:$0xff] }
 0x102   : > { %v1383_v28 = vmax.f32 %v511_v12, %v512_v21 }
 0x107   : > { %391 = vxpose.xlu1.b32.cont [15/16] (narrow) %v199_v23, 16 }
 0x108   : > { %359 = vxpose.xlu0.b32.cont [15/16] (narrow) %v183_v24, 16 }
 0x109   : > { %423 = vxpose.xlu2.b32.cont [15/16] (narrow) %v215_v34, 16 }
 0x10f   : > { %392 = vxpose.xlu1.b32.end [16/16] (narrow) %v200_v26, 16  ;;  %v516_v26 = vrot.slane %v515_v19, 4 }
 0x110   : > { %360 = vxpose.xlu0.b32.end [16/16] (narrow) %v184_v27, 16 }
 0x111   : > { %424 = vxpose.xlu2.b32.end [16/16] (narrow) %v216_v37, 16  ;;  %v517_v34 = vmax.f32 %v515_v19, %v516_v26  ;;  %v1391_v37 = vsub.f32 %v266_v59, %v1383_v28 }
 0x117   : > { %473 = vxpose.xlu1.b32.start [1/16] (narrow) %v233_v29, 16 }
 0x118   : > { %441 = vxpose.xlu0.b32.start [1/16] (narrow) %v217_v30, 16  ;;  %v248_v30 = vld [vmem:[%s1222_s22 + $0x3f8] sm:$0xff] }
 0x11f   : > { %474 = vxpose.xlu1.b32.cont [2/16] (narrow) %v234_v32, 16 }
 0x120   : > { %442 = vxpose.xlu0.b32.cont [2/16] (narrow) %v218_v33, 16  ;;  %v526_v33 = vrot.slane %v525_v25, 2 }
 0x127   : > { %475 = vxpose.xlu1.b32.cont [3/16] (narrow) %v235_v35, 16 }
 0x128   : > { %443 = vxpose.xlu0.b32.cont [3/16] (narrow) %v219_v36, 16 }
 0x12f   : > { %476 = vxpose.xlu1.b32.cont [4/16] (narrow) %v236_v38, 16  ;;  %v1394_v38 = vsub.f32 %v265_v54, %v1383_v28 }
 0x130   : > { %444 = vxpose.xlu0.b32.cont [4/16] (narrow) %v220_v39, 16 }
 0x132   : > { %v1357_v4 = vpop.trf.xlu2 }
 0x137   : > { %477 = vxpose.xlu1.b32.cont [5/16] (narrow) %v237_v40, 16  ;;  %v527_v40 = vmax.f32 %v525_v25, %v526_v33 }
 0x138   : > { %445 = vxpose.xlu0.b32.cont [5/16] (narrow) %v221_v41, 16  ;;  %v518_v41 = vrot.slane %v517_v34, 2 }
 0x13a   : > { %v1370_v15 = vpop.trf.xlu2 }
 0x13b   : > { %v1361_v8 = vpop.trf.xlu1  ;;  %v546_v22 = vsel %vm505_vm0, %v1370_v15, -inf }
 0x13c   : > { %v1355_v3 = vpop.trf.xlu0  ;;  %v547_v27 = vmax.f32 %v1357_v4, %v546_v22 }
 0x13e   : > { %v548_v35 = vrot.slane %v547_v27, 4 }
 0x13f   : > { %478 = vxpose.xlu1.b32.cont [6/16] (narrow) %v238_v42, 16 }
 0x140   : > { %446 = vxpose.xlu0.b32.cont [6/16] (narrow) %v222_v43, 16  ;;  %v549_v42 = vmax.f32 %v547_v27, %v548_v35 }
 0x143   : > { %v1379_v23 = vpop.trf.xlu1 }
 0x144   : > { %v1368_v14 = vpop.trf.xlu0  ;;  %v538_v29 = vsel %vm505_vm0, %v1379_v23, -inf }
 0x145   : > { %v530_v20 = vsel %vm505_vm0, %v1368_v14, -inf  ;;  %v539_v36 = vmax.f32 %v1361_v8, %v538_v29 }
 0x146   : > { %v531_v24 = vmax.f32 %v1355_v3, %v530_v20 }
 0x147   : > { %479 = vxpose.xlu1.b32.cont [7/16] (narrow) %v239_v44, 16  ;;  %v540_v43 = vrot.slane %v539_v36, 4  ;;  %v602_v44 = vmul.f32 1.442695, %v1391_v37 }
 0x148   : > { %447 = vxpose.xlu0.b32.cont [7/16] (narrow) %v223_v45, 16  ;;  %v532_v32 = vrot.slane %v531_v24, 4  ;;  %v586_v45 = vmul.f32 1.442695, %v1394_v38 }
 0x149   : > { %1048 = vpow2.f32 %v602_v44 }
 0x14a   : > { %v533_v39 = vmax.f32 %v531_v24, %v532_v32  ;;  %1050 = vpow2.f32 %v586_v45 }
 0x14f   : > { %480 = vxpose.xlu1.b32.cont [8/16] (narrow) %v240_v46, 16  ;;  %v534_v46 = vrot.slane %v533_v39, 2 }
 0x150   : > { %448 = vxpose.xlu0.b32.cont [8/16] (narrow) %v224_v47, 16  ;;  %v528_v47 = vrot.slane %v527_v40, 1 }
 0x157   : > { %481 = vxpose.xlu1.b32.cont [9/16] (narrow) %v241_v48, 16  ;;  %v519_v48 = vmax.f32 %v517_v34, %v518_v41 }
 0x158   : > { %449 = vxpose.xlu0.b32.cont [9/16] (narrow) %v225_v49, 16  ;;  %v550_v49 = vrot.slane %v549_v42, 2 }
 0x15a   : > { %v551_v54 = vmax.f32 %v549_v42, %v550_v49 }
 0x15f   : > { %482 = vxpose.xlu1.b32.cont [10/16] (narrow) %v242_v50, 16  ;;  %v541_v50 = vmax.f32 %v539_v36, %v540_v43 }
 0x160   : > { %450 = vxpose.xlu0.b32.cont [10/16] (narrow) %v226_v51, 16  ;;  %v535_v51 = vmax.f32 %v533_v39, %v534_v46 }
 0x162   : > { %v536_v59 = vrot.slane %v535_v51, 1 }
 0x167   : > { %483 = vxpose.xlu1.b32.cont [11/16] (narrow) %v243_v52, 16  ;;  %v1398_v52 = vmax.f32 %v527_v40, %v528_v47 }
 0x168   : > { %451 = vxpose.xlu0.b32.cont [11/16] (narrow) %v227_v53, 16  ;;  %v520_v53 = vrot.slane %v519_v48, 1 }
 0x169   : > { %v1402_v60 = vsub.f32 %v1349_v61, %v1398_v52 }
 0x16a   : > { %v1404_v62 = vmax.f32 %v519_v48, %v520_v53 }
 0x16b   : > { %v606_v9 = vmul.f32 1.442695, %v1402_v60 }
 0x16c   : > { %v1416_v10 = vsub.f32 %v1353_v1, %v1404_v62  ;;  %v1422_v13 = vsub.f32 %v1344_v56, %v1404_v62 }
 0x16d   : > { %1052 = vpow2.f32 %v606_v9 }
 0x16e   : > { %v588_v20 = vmul.f32 1.442695, %v1422_v13 }
 0x16f   : > { %484 = vxpose.xlu1.b32.cont [12/16] (narrow) %v244_v57, 16  ;;  %v542_v57 = vrot.slane %v541_v50, 2 }
 0x170   : > { %452 = vxpose.xlu0.b32.cont [12/16] (narrow) %v228_v58, 16  ;;  %v1049_v58 = vpop.eup %1048 }
 0x171   : > { %v1051_v2 = vpop.eup %1050  ;;  %v698_v5 = vsel %vm505_vm0, %v1049_v58, 0.0  ;;  %v626_v32 = vmul.f32 %v1049_v58, %v1391_v37 }
 0x172   : > { %v699_v12 = vadd.f32 %v1051_v2, %v698_v5 }
 0x173   : > { %v1053_v25 = vpop.eup %1052  ;;  %v634_v42 = vsel %vm505_vm0, %v626_v32, 0.0 }
 0x174   : > { %v700_v19 = vrot.slane %v699_v12, 4  ;;  %v628_v5 = vmul.f32 %v1053_v25, %v1402_v60 }
 0x176   : > { %v701_v24 = vadd.f32 %v700_v19, %v699_v12 }
 0x177   : > { %485 = vxpose.xlu1.b32.cont [13/16] (narrow) %v245_v63, 16  ;;  %v552_v63 = vrot.slane %v551_v54, 1 }
 0x178   : > { %453 = vxpose.xlu0.b32.cont [13/16] (narrow) %v229_v0, 16  ;;  %v543_v0 = vmax.f32 %v541_v50, %v542_v57 }
 0x179   : > { %v1418_v61 = vmax.f32 %v551_v54, %v552_v63 }
 0x17a   : > { %v544_v11 = vrot.slane %v543_v0, 1 }
 0x17b   : > { %v1432_v1 = vsub.f32 %v1370_v15, %v1418_v61  ;;  %v1444_v21 = vsub.f32 %v1357_v4, %v1418_v61 }
 0x17c   : > { %v1434_v18 = vmax.f32 %v543_v0, %v544_v11 }
 0x17d   : > { %v612_v15 = vmul.f32 1.442695, %v1432_v1  ;;  %v596_v26 = vmul.f32 1.442695, %v1444_v21 }
 0x17e   : > { %v1449_v22 = vsub.f32 %v1379_v23, %v1434_v18  ;;  %v1455_v27 = vsub.f32 %v1361_v8, %v1434_v18  ;;  %v714_v23 = vsel %vm505_vm0, %v1053_v25, 0.0  ;;  %v618_v8 = vmul.f32 %v1051_v2, %v1394_v38 }
 0x17f   : > { %486 = vxpose.xlu1.b32.cont [14/16] (narrow) %v246_v6, 16  ;;  %v1409_v6 = vsub.f32 %v1342_v55, %v1398_v52 }
 0x180   : > { %454 = vxpose.xlu0.b32.cont [14/16] (narrow) %v230_v7, 16  ;;  %v1411_v7 = vmax.f32 %v535_v51, %v536_v59  ;;  %v610_v4 = vmul.f32 1.442695, %v1449_v22  ;;  %v594_v33 = vmul.f32 1.442695, %v1455_v27  ;;  %v635_v47 = vadd.f32 %v634_v42, %v618_v8 }
 0x182   : > { %v1427_v55 = vsub.f32 %v1368_v14, %v1411_v7  ;;  %v1439_v56 = vsub.f32 %v1355_v3, %v1411_v7  ;;  %v636_v58 = vrot.slane %v635_v47, 4 }
 0x184   : > { %v608_v14 = vmul.f32 1.442695, %v1427_v55  ;;  %v592_v3 = vmul.f32 1.442695, %v1439_v56 }
 0x187   : > { %487 = vxpose.xlu1.b32.cont [15/16] (narrow) %v247_v16, 16  ;;  %v590_v16 = vmul.f32 1.442695, %v1409_v6 }
 0x188   : > { %455 = vxpose.xlu0.b32.cont [15/16] (narrow) %v231_v17, 16  ;;  %v604_v17 = vmul.f32 1.442695, %v1416_v10 }
 0x189   : > { %1054 = vpow2.f32 %v590_v16 }
 0x18a   : > { %1056 = vpow2.f32 %v604_v17 }
 0x18b   : > { %1058 = vpow2.f32 %v588_v20  ;;  %v637_v20 = vadd.f32 %v636_v58, %v635_v47 }
 0x18c   : > { %1060 = vpow2.f32 %v608_v14 }
 0x18d   : > { %1062 = vpow2.f32 %v612_v15 }
 0x18e   : > { %1064 = vpow2.f32 %v592_v3 }
 0x18f   : > { %488 = vxpose.xlu1.b32.end [16/16] (narrow) %v248_v30, 16  ;;  %v1055_v29 = vpop.eup %1054  ;;  %v702_v30 = vrot.slane %v701_v24, 2  ;;  %1066 = vpow2.f32 %v596_v26 }
 0x190   : > { %456 = vxpose.xlu0.b32.end [16/16] (narrow) %v232_v31, 16  ;;  %v1057_v31 = vpop.eup %1056  ;;  %v715_v35 = vadd.f32 %v1055_v29, %v714_v23  ;;  %1068 = vpow2.f32 %v610_v4  ;;  %v620_v14 = vmul.f32 %v1055_v29, %v1409_v6 }
 0x191   : > { %v1059_v34 = vpop.eup %1058  ;;  %v703_v39 = vadd.f32 %v702_v30, %v701_v24  ;;  %v706_v40 = vsel %vm505_vm0, %v1057_v31, 0.0  ;;  %1070 = vpow2.f32 %v594_v33  ;;  %v627_v9 = vmul.f32 %v1057_v31, %v1416_v10 }
 0x192   : > { %v1461_v36 = vpop.eup %1060  ;;  %v716_v43 = vrot.slane %v715_v35, 4  ;;  %v707_v44 = vadd.f32 %v1059_v34, %v706_v40  ;;  %v619_v15 = vmul.f32 %v1059_v34, %v1422_v13  ;;  %v650_v24 = vsel %vm505_vm0, %v628_v5, 0.0 }
 0x193   : > { %v1465_v41 = vpop.eup %1062  ;;  %v722_v45 = vsel %vm505_vm0, %v1461_v36, 0.0  ;;  %v704_v48 = vrot.slane %v703_v39, 1  ;;  %v642_v3 = vsel %vm505_vm0, %v627_v9, 0.0  ;;  %v638_v30 = vrot.slane %v637_v20, 2 }
 0x194   : > { %v1468_v37 = vpop.eup %1064  ;;  %v738_v38 = vsel %vm505_vm0, %v1465_v41, 0.0  ;;  %v717_v51 = vadd.f32 %v716_v43, %v715_v35  ;;  %v708_v53 = vrot.slane %v707_v44, 4  ;;  %v651_v32 = vadd.f32 %v650_v24, %v620_v14 }
 0x195   : > { %v1472_v46 = vpop.eup %1066  ;;  %v723_v50 = vadd.f32 %v1468_v37, %v722_v45  ;;  %v1482_v59 = vadd.f32 %v704_v48, %v703_v39  ;;  %v643_v33 = vadd.f32 %v642_v3, %v619_v15 }
 0x196   : > { %v1476_v49 = vpop.eup %1068  ;;  %v739_v54 = vadd.f32 %v1472_v46, %v738_v38  ;;  %v718_v12 = vrot.slane %v717_v51, 2  ;;  %v709_v16 = vadd.f32 %v708_v53, %v707_v44  ;;  %v1504_v44 = vadd.f32 %v638_v30, %v637_v20 }
 0x197   : > { %v1480_v57 = vpop.eup %1070  ;;  %v730_v63 = vsel %vm505_vm0, %v1476_v49, 0.0  ;;  %v724_v11 = vrot.slane %v723_v50, 4  ;;  %1072 = vrcp.f32 %v1482_v59  ;;  %v652_v38 = vrot.slane %v651_v32, 4 }
 0x198   : > { %v740_v17 = vrot.slane %v739_v54, 4  ;;  %v731_v19 = vadd.f32 %v1480_v57, %v730_v63  ;;  %v719_v25 = vadd.f32 %v718_v12, %v717_v51  ;;  %v710_v10 = vrot.slane %v709_v16, 2 }
 0x199   : > { %v725_v60 = vadd.f32 %v724_v11, %v723_v50  ;;  %v644_v50 = vrot.slane %v643_v33, 4  ;;  %v629_v51 = vmul.f32 %v1461_v36, %v1427_v55  ;;  %v640_v12 = vrot.slane %v1504_v44, 1 }
 0x19a   : > { %v741_v26 = vadd.f32 %v740_v17, %v739_v54  ;;  %v732_v4 = vrot.slane %v731_v19, 4  ;;  %v720_v39 = vrot.slane %v719_v25, 1  ;;  %v711_v40 = vadd.f32 %v710_v10, %v709_v16 }
 0x19b   : > { %v726_v13 = vrot.slane %v725_v60, 2  ;;  %v771_v16 = vand.u32 2147483647, %v1482_v59  ;;  %v653_v14 = vadd.f32 %v652_v38, %v651_v32  ;;  %v645_v15 = vadd.f32 %v644_v50, %v643_v33 }
 0x19c   : > { %v742_v42 = vrot.slane %v741_v26, 2  ;;  %v733_v43 = vadd.f32 %v732_v4, %v731_v19  ;;  %v1510_v63 = vadd.f32 %v720_v39, %v719_v25  ;;  %v712_v5 = vrot.slane %v711_v40, 1 }
 0x19d   : > { %v1500_v29 = vpop.eup %1072  ;;  %v727_v53 = vadd.f32 %v726_v13, %v725_v60  ;;  %v621_v55 = vmul.f32 %v1468_v37, %v1439_v56  ;;  %v658_v36 = vsel %vm505_vm0, %v629_v51, 0.0  ;;  %vm767_vm1 = vweird.f32 %v1482_v59 }
 0x19e   : > { %v763_v48 = vmul.f32 %v1500_v29, %v1482_v59  ;;  %v743_v9 = vadd.f32 %v742_v42, %v741_v26  ;;  %v734_v11 = vrot.slane %v733_v43, 2  ;;  %1074 = vrcp.f32 %v1510_v63 }
 0x19f   : > { %v728_v24 = vrot.slane %v727_v53, 1  ;;  %v1518_v25 = vadd.f32 %v712_v5, %v711_v40  ;;  %v773_v4 = vand.u32 2147483648, %v1482_v59  ;;  %v654_v56 = vrot.slane %v653_v14, 2 }
 0x1a0   : > { %v764_v20 = vsub.f32 1.0, %v763_v48  ;;  %v744_v10 = vrot.slane %v743_v9, 1  ;;  %v735_v26 = vadd.f32 %v734_v11, %v733_v43  ;;  %v646_v37 = vrot.slane %v645_v15, 2 }
 0x1a1   : > { %vm1523_vm2 = vcmp.eq.f32.partialorder %v771_v16, 8.507059e+37  ;;  %v1527_v13 = vadd.f32 %v728_v24, %v727_v53  ;;  %vm768_vm3 = vweird.f32 %v1500_v29  ;;  %1076 = vrcp.f32 %v1518_v25 }
 0x1a2   : > { %v765_v33 = vmul.f32 %v1500_v29, %v764_v20  ;;  %v1535_v39 = vadd.f32 %v744_v10, %v743_v9  ;;  %v736_v40 = vrot.slane %v735_v26, 1  ;;  %v655_v50 = vadd.f32 %v654_v56, %v653_v14  ;;  %vm1554_vm4 = vmor %vm767_vm1, %vm768_vm3 }
 0x1a3   : > { %v647_v51 = vadd.f32 %v646_v37, %v645_v15  ;;  %1078 = vrcp.f32 %v1527_v13  ;;  %v630_v9 = vmul.f32 %v1476_v49, %v1449_v22  ;;  %v623_v14 = vmul.f32 %v1472_v46, %v1444_v21 }
 0x1a4   : > { %v1549_v48 = vpop.eup %1074  ;;  %v766_v38 = vadd.f32 %v1500_v29, %v765_v33  ;;  %1080 = vrcp.f32 %v1535_v39  ;;  %v1569_v11 = vadd.f32 %v736_v40, %v735_v26  ;;  %v788_v22 = vand.u32 2147483648, %v1518_v25 }
 0x1a5   : > { %v793_v59 = vmul.f32 %v1549_v48, %v1510_v63  ;;  %v648_v20 = vrot.slane %v647_v51, 1  ;;  %v622_v15 = vmul.f32 %v1480_v57, %v1455_v27  ;;  %v666_v24 = vsel %vm505_vm0, %v630_v9, 0.0 }
 0x1a6   : > { %v801_v27 = vand.u32 2147483647, %v1510_v63  ;;  %vm797_vm5 = vweird.f32 %v1510_v63  ;;  %vm798_vm6 = vweird.f32 %v1549_v48  ;;  %vm782_vm8 = vweird.f32 %v1518_v25 }
 0x1a7   : > { %v1571_v16 = vpop.eup %1076  ;;  %v667_v33 = vadd.f32 %v666_v24, %v622_v15  ;;  %vm1637_vm9 = vmor %vm797_vm5, %vm798_vm6  ;;  %vm812_vm10 = vweird.f32 %v1527_v13  ;;  %vm842_vm14 = vweird.f32 %v1535_v39  ;;  %vm827_vm1 = vweird.f32 %v1569_v11 }
 0x1a8   : > { %v778_v57 = vmul.f32 %v1571_v16, %v1518_v25  ;;  %vm1616_vm7 = vcmp.eq.f32.partialorder %v801_v27, 8.507059e+37  ;;  %vm783_vm11 = vweird.f32 %v1571_v16 }
 0x1bb   : > { %v1486_v0 = vpop.trf.xlu1 }
 0x1bc   : > { %v1488_v2 = vpop.trf.xlu0 }
 0x1c3   : > { %v490_v23 = vpop.trf.xlu1 }
 0x1c4   : > { %v458_v31 = vpop.trf.xlu0  ;;  %v562_v35 = vsel %vm505_vm0, %v490_v23, -inf }
 0x1c5   : > { %v554_v6 = vsel %vm505_vm0, %v458_v31, -inf  ;;  %v563_v34 = vmax.f32 %v1486_v0, %v562_v35  ;;  %v659_v35 = vadd.f32 %v658_v36, %v621_v55  ;;  %v1583_v55 = vpop.eup %1078  ;;  %v794_v36 = vsub.f32 1.0, %v793_v59 }
 0x1c6   : > { %v555_v8 = vmax.f32 %v1488_v2, %v554_v6  ;;  %v1592_v21 = vpop.eup %1080  ;;  %vm813_vm13 = vweird.f32 %v1583_v55 }
 0x1c7   : > { %v564_v45 = vrot.slane %v563_v34, 4  ;;  %v660_v53 = vrot.slane %v659_v35, 4  ;;  %v795_v37 = vmul.f32 %v1549_v48, %v794_v36  ;;  %v816_v36 = vand.u32 2147483647, %v1527_v13  ;;  %vm1685_vm3 = vmor %vm812_vm10, %vm813_vm13 }
 0x1c8   : > { %v556_v47 = vrot.slane %v555_v8, 4  ;;  %vm843_vm15 = vweird.f32 %v1592_v21 }
 0x1c9   : > { %v565_v54 = vmax.f32 %v563_v34, %v564_v45  ;;  %vm1701_vm5 = vcmp.eq.f32.partialorder %v816_v36, 8.507059e+37 }
 0x1ca   : > { %v557_v58 = vmax.f32 %v555_v8, %v556_v47 }
 0x1cb   : > { %v566_v17 = vrot.slane %v565_v54, 2 }
 0x1cc   : > { %v558_v19 = vrot.slane %v557_v58, 2 }
 0x1cd   : > { %v567_v3 = vmax.f32 %v565_v54, %v566_v17  ;;  %v774_v54 = vor.u32 1.1754944e-38, %v773_v4  ;;  %v770_v17 = vsel %vm1554_vm4, %v1500_v29, %v766_v38  ;;  %v1588_v29 = vadd.f32 %v640_v12, %v1504_v44  ;;  %vm1694_vm4 = vmor %vm842_vm14, %vm843_vm15 }
 0x1ce   : > { %v559_v60 = vmax.f32 %v557_v58, %v558_v19  ;;  %v631_v58 = vmul.f32 %v1465_v41, %v1432_v1  ;;  %v656_v1 = vrot.slane %v655_v50, 1  ;;  %v661_v41 = vadd.f32 %v660_v53, %v659_v35 }
 0x1cf   : > { %v568_v30 = vrot.slane %v567_v3, 1  ;;  %v803_v19 = vand.u32 2147483648, %v1510_v63  ;;  %v1596_v46 = vsel %vm1523_vm2, %v774_v54, %v770_v17  ;;  %v1606_v4 = vadd.f32 %v648_v20, %v647_v51 }
 0x1d0   : > { %v560_v32 = vrot.slane %v559_v60, 1  ;;  %v674_v49 = vsel %vm505_vm0, %v631_v58, 0.0  ;;  %v1601_v44 = vadd.f32 %v656_v1, %v655_v50  ;;  %v808_v35 = vmul.f32 %v1583_v55, %v1527_v13 }
 0x1d1   : > { %v1529_v34 = vmax.f32 %v567_v3, %v568_v30  ;;  %v662_v3 = vrot.slane %v661_v41, 2  ;;  %v1604_v12 = vor.u32 1.1754944e-38, %v803_v19  ;;  %v675_v10 = vadd.f32 %v674_v49, %v623_v14 }
 0x1d2   : > { %v1531_v8 = vmax.f32 %v559_v60, %v560_v32  ;;  %v786_v30 = vand.u32 2147483647, %v1518_v25  ;;  %v1609_v32 = vor.u32 1.1754944e-38, %v788_v22  ;;  %v779_v51 = vsub.f32 1.0, %v778_v57 }
 0x1d3   : > { %v1539_v42 = vsub.f32 %v1486_v0, %v1529_v34  ;;  %v585_v43 = vsub.f32 %v490_v23, %v1529_v34  ;;  %v1620_v53 = vadd.f32 %v662_v3, %v661_v41  ;;  %v668_v58 = vrot.slane %v667_v33, 4 }
 0x1d4   : > { %v1544_v45 = vsub.f32 %v1488_v2, %v1531_v8  ;;  %v1547_v47 = vsub.f32 %v458_v31, %v1531_v8  ;;  %v796_v17 = vadd.f32 %v1549_v48, %v795_v37  ;;  %v809_v1 = vsub.f32 1.0, %v808_v35 }
 0x1d5   : > { %v600_v2 = vmul.f32 1.442695, %v1539_v42  ;;  %v616_v23 = vmul.f32 1.442695, %v585_v43  ;;  %v838_v41 = vmul.f32 %v1592_v21, %v1535_v39  ;;  %v664_v49 = vrot.slane %v1620_v53, 1 }
 0x1d6   : > { %v598_v31 = vmul.f32 1.442695, %v1544_v45  ;;  %v614_v5 = vmul.f32 1.442695, %v1547_v47  ;;  %v669_v63 = vadd.f32 %v668_v58, %v667_v33  ;;  %v800_v57 = vsel %vm1637_vm9, %v1549_v48, %v796_v17 }
 0x1d7   : > { %1082 = vpow2.f32 %v600_v2  ;;  %v780_v3 = vmul.f32 %v1571_v16, %v779_v51  ;;  %vm1654_vm12 = vcmp.eq.f32.partialorder %v786_v30, 8.507059e+37  ;;  %v848_v25 = vand.u32 2147483648, %v1535_v39 }
 0x1d8   : > { %1084 = vpow2.f32 %v616_v23  ;;  %v676_v23 = vrot.slane %v675_v10, 4  ;;  %v670_v48 = vrot.slane %v669_v63, 2 }
 0x1d9   : > { %1086 = vpow2.f32 %v598_v31 }
 0x1da   : > { %1088 = vpow2.f32 %v614_v5  ;;  %v671_v50 = vadd.f32 %v670_v48, %v669_v63 }
 0x1db   : > { %1090 = vrcp.f32 %v1569_v11 }
 0x1dd   : > { %v1083_v60 = vpop.eup %1082 }
 0x1de   : > { %v1085_v26 = vpop.eup %1084  ;;  %v625_v31 = vmul.f32 %v1083_v60, %v1539_v42 }
 0x1df   : > { %v1087_v56 = vpop.eup %1086  ;;  %v633_v6 = vmul.f32 %v1085_v26, %v585_v43  ;;  %v754_v40 = vsel %vm505_vm0, %v1085_v26, 0.0 }
 0x1e0   : > { %v1089_v38 = vpop.eup %1088  ;;  %v755_v0 = vadd.f32 %v1083_v60, %v754_v40  ;;  %v624_v19 = vmul.f32 %v1087_v56, %v1544_v45  ;;  %v677_v45 = vadd.f32 %v676_v23, %v675_v10  ;;  %v810_v60 = vmul.f32 %v1583_v55, %v809_v1 }
 0x1e1   : > { %v1622_v2 = vpop.eup %1090  ;;  %v632_v43 = vmul.f32 %v1089_v38, %v1547_v47  ;;  %v746_v54 = vsel %vm505_vm0, %v1089_v38, 0.0  ;;  %v690_v5 = vsel %vm505_vm0, %v633_v6, 0.0  ;;  %v818_v10 = vand.u32 2147483648, %v1527_v13 }
 0x1e2   : > { %v756_v59 = vrot.slane %v755_v0, 4  ;;  %v747_v9 = vadd.f32 %v1087_v56, %v746_v54  ;;  %v823_v47 = vmul.f32 %v1622_v2, %v1569_v11  ;;  %v691_v15 = vadd.f32 %v690_v5, %v625_v31 }
 0x1e3   : > { %v682_v14 = vsel %vm505_vm0, %v632_v43, 0.0  ;;  %v839_v56 = vsub.f32 1.0, %v838_v41  ;;  %v678_v33 = vrot.slane %v677_v45, 2  ;;  %v805_v23 = vsel %vm1616_vm7, %v1604_v12, %v800_v57  ;;  %vm1674_vm0 = vmor %vm782_vm8, %vm783_vm11 }
 0x1e4   : > { %v757_v20 = vadd.f32 %v756_v59, %v755_v0  ;;  %v748_v22 = vrot.slane %v747_v9, 4  ;;  %v683_v26 = vadd.f32 %v682_v14, %v624_v19  ;;  %v824_v37 = vsub.f32 1.0, %v823_v47 }
 0x1e5   : > { %v692_v40 = vrot.slane %v691_v15, 4  ;;  %v781_v31 = vadd.f32 %v1571_v16, %v780_v3  ;;  %v811_v43 = vadd.f32 %v1583_v55, %v810_v60  ;;  %v840_v58 = vmul.f32 %v1592_v21, %v839_v56 }
 0x1e6   : > { %v758_v24 = vrot.slane %v757_v20, 2  ;;  %v749_v27 = vadd.f32 %v748_v22, %v747_v9  ;;  %v684_v54 = vrot.slane %v683_v26, 4  ;;  %v825_v30 = vmul.f32 %v1622_v2, %v824_v37 }
 0x1e7   : > { %v679_v9 = vadd.f32 %v678_v33, %v677_v45  ;;  %v693_v17 = vadd.f32 %v692_v40, %v691_v15  ;;  %vm828_vm2 = vweird.f32 %v1622_v2  ;;  %v833_v41 = vand.u32 2147483648, %v1569_v11 }
 0x1e8   : > { %v759_v35 = vadd.f32 %v758_v24, %v757_v20  ;;  %v750_v6 = vrot.slane %v749_v27, 2  ;;  %v685_v19 = vadd.f32 %v684_v54, %v683_v26  ;;  %v841_v47 = vadd.f32 %v1592_v21, %v840_v58  ;;  %vm1707_vm6 = vmor %vm827_vm1, %vm828_vm2 }
 0x1e9   : > { %v846_v14 = vand.u32 2147483647, %v1535_v39  ;;  %v826_v13 = vadd.f32 %v1622_v2, %v825_v30  ;;  %v831_v22 = vand.u32 2147483647, %v1569_v11  ;;  %v819_v15 = vor.u32 1.1754944e-38, %v818_v10 }
 0x1ea   : > { %v760_v51 = vrot.slane %v759_v35, 1  ;;  %v751_v0 = vadd.f32 %v750_v6, %v749_v27  ;;  %v694_v24 = vrot.slane %v693_v17, 2  ;;  %v806_v39 = vmul.f32 %v805_v23, %v1601_v44 }
 0x1eb   : > { %v785_v27 = vsel %vm1674_vm0, %v1571_v16, %v781_v31  ;;  %v680_v36 = vrot.slane %v679_v9, 1  ;;  %v672_v57 = vrot.slane %v671_v50, 1  ;;  %v815_v3 = vsel %vm1685_vm3, %v1583_v55, %v811_v43 }
 0x1ec   : > { %v1666_v5 = vadd.f32 %v760_v51, %v759_v35  ;;  %v752_v59 = vrot.slane %v751_v0, 1  ;;  %v849_v11 = vor.u32 1.1754944e-38, %v848_v25  ;;  %v834_v60 = vor.u32 1.1754944e-38, %v833_v41 }
 0x1ed   : > { %v686_v26 = vrot.slane %v685_v19, 2  ;;  %v845_v37 = vsel %vm1694_vm4, %v1592_v21, %v841_v47  ;;  %vm847_vm7 = vcmp.eq.f32.partialorder %v846_v14, 8.507059e+37  ;;  %v830_v44 = vsel %vm1707_vm6, %v1622_v2, %v826_v13 }
 0x1ee   : > { %1092 = vrcp.f32 %v1666_v5  ;;  %v1691_v42 = vadd.f32 %v752_v59, %v751_v0  ;;  %vm832_vm8 = vcmp.eq.f32.partialorder %v831_v22, 8.507059e+37  ;;  %v776_v16 = vmul.f32 %v1596_v46, %v1588_v29 }
 0x1ef   : > { %v790_v55 = vsel %vm1654_vm12, %v1609_v32, %v785_v27  ;;  %v695_v35 = vadd.f32 %v694_v24, %v693_v17  ;;  %v665_v21 = vadd.f32 %v664_v49, %v1620_v53  ;;  %v820_v10 = vsel %vm1701_vm5, %v819_v15, %v815_v3 }
 0x1f0   : > { %1094 = vrcp.f32 %v1691_v42  ;;  %v681_v33 = vadd.f32 %v680_v36, %v679_v9  ;;  %v673_v2 = vadd.f32 %v672_v57, %v671_v50  ;;  %v850_v48 = vsel %vm847_vm7, %v849_v11, %v845_v37 }
 0x1f1   : > { %v835_v51 = vsel %vm832_vm8, %v834_v60, %v830_v44  ;;  %v687_v46 = vadd.f32 %v686_v26, %v685_v19  ;;  %v884_v38 = vadd.f32 %v806_v39, %v1398_v52  ;;  %v791_v32 = vmul.f32 %v790_v55, %v1606_v4 }
 0x1f2   : > { %v878_v0 = vand.u32 2147483648, %v1666_v5  ;;  %v696_v31 = vrot.slane %v695_v35, 1  ;;  %v876_v49 = vand.u32 2147483647, %v1666_v5  ;;  %v821_v43 = vmul.f32 %v820_v10, %v665_v21 }
 0x1f3   : > { %v851_v54 = vmul.f32 %v850_v48, %v681_v33  ;;  %v836_v58 = vmul.f32 %v835_v51, %v673_v2  ;;  %vm872_vm10 = vweird.f32 %v1666_v5  ;;  %v688_v52 = vrot.slane %v687_v46, 1 }
 0x1f4   : > { %v1093_v56 = vpop.eup %1092  ;;  %v863_v4 = vand.u32 2147483648, %v1691_v42  ;;  %v879_v9 = vor.u32 1.1754944e-38, %v878_v0  ;;  %v861_v12 = vand.u32 2147483647, %v1691_v42  ;;  %v883_v50 = vadd.f32 %v791_v32, %v1404_v62 }
 0x1f5   : > { %v868_v6 = vmul.f32 %v1093_v56, %v1666_v5  ;;  %vm873_vm9 = vweird.f32 %v1093_v56  ;;  %v697_v1 = vadd.f32 %v696_v31, %v695_v35  ;;  %vm877_vm13 = vcmp.eq.f32.partialorder %v876_v49, 8.507059e+37 }
 0x1f6   : > { %v1095_v40 = vpop.eup %1094  ;;  %vm874_vm11 = vmor %vm872_vm10, %vm873_vm9  ;;  %v885_v41 = vadd.f32 %v821_v43, %v1411_v7  ;;  %vm857_vm14 = vweird.f32 %v1691_v42  ;;  %v887_v47 = vadd.f32 %v851_v54, %v1418_v61  ;;  %v864_v14 = vor.u32 1.1754944e-38, %v863_v4 }
 0x1f7   : > { %v869_v29 = vsub.f32 1.0, %v868_v6  ;;  %v853_v23 = vmul.f32 %v1095_v40, %v1691_v42  ;;  %vm858_vm12 = vweird.f32 %v1095_v40  ;;  %v886_v13 = vadd.f32 %v836_v58, %v1434_v18 }
 0x1f8   : > { %vm859_vm15 = vmor %vm857_vm14, %vm858_vm12  ;;  %v689_v62 = vadd.f32 %v688_v52, %v687_v46  ;;  %vm862_vm0 = vcmp.eq.f32.partialorder %v861_v12, 8.507059e+37  ;;  %v882_v7 = vadd.f32 %v776_v16, %v1383_v28  ;;  %v898_v45 = vrot.slane %v883_v50, 7 }
 0x1f9   : > { %v870_v53 = vmul.f32 %v1093_v56, %v869_v29  ;;  %v854_v30 = vsub.f32 1.0, %v853_v23  ;;  %v899_v63 = vrot.slane %v884_v38, 6  ;;  %v900_v61 = vrot.slane %v885_v41, 5 }
 0x1fa   : > { %vm905_vm1 = vcmask 1040384   ;;  %vm907_vm2 = vcmask 1042434   ;;  %v902_v18 = vrot.slane %v887_v47, 3  ;;  %v901_v39 = vrot.slane %v886_v13, 4 }
 0x1fb   : > { %v871_v59 = vadd.f32 %v1093_v56, %v870_v53  ;;  %v855_v17 = vmul.f32 %v1095_v40, %v854_v30  ;;  %v906_v28 = vsel %vm905_vm1, %v882_v7, %v898_v45  ;;  %vm911_vm3 = vcmask 1044484  }
 0x1fc   : > { %vm913_vm4 = vcmask 1046534   ;;  %v908_v57 = vsel %vm907_vm2, %v899_v63, %v900_v61  ;;  %vm909_vm5 = vcmask 1041408   ;;  %vm915_vm6 = vcmask 1045508  }
 0x1fd   : > { %v875_v25 = vsel %vm874_vm11, %v1093_v56, %v871_v59  ;;  %v856_v19 = vadd.f32 %v1095_v40, %v855_v17  ;;  %vm917_vm7 = vcmask 1043456   ;;  %v912_v3 = vsel %vm911_vm3, %v901_v39, %v902_v18 }
 0x1fe   : > { %v880_v5 = vsel %vm877_vm13, %v879_v9, %v875_v25  ;;  %v910_v60 = vsel %vm909_vm5, %v906_v28, %v908_v57 }
 0x1ff   : > { %v881_v20 = vmul.f32 %v880_v5, %v697_v1  ;;  %v860_v22 = vsel %vm859_vm15, %v1095_v40, %v856_v19 }
 0x200   : > { %v865_v42 = vsel %vm862_vm0, %v864_v14, %v860_v22 }
 0x201   : > { %v889_v15 = vadd.f32 %v881_v20, %v1529_v34  ;;  %v866_v24 = vmul.f32 %v865_v42, %v689_v62 }
 0x203   : > { %v904_v27 = vrot.slane %v889_v15, 1  ;;  %v888_v36 = vadd.f32 %v866_v24, %v1531_v8 }
 0x205   : > { %v903_v34 = vrot.slane %v888_v36, 2 }
 0x207   : > { %v914_v11 = vsel %vm913_vm4, %v903_v34, %v904_v27 }
 0x208   : > { %v916_v26 = vsel %vm915_vm6, %v912_v3, %v914_v11 }
 0x209   : > { %v918_v8 = vsel %vm917_vm7, %v910_v60, %v916_v26 }
 0x20a   : > { %920 = vst [vmem:[%s112_s29] sm:$0xff] %v918_v8 }
 0x20b   : > { %1123 = shalt.err (!%p1120_p3)
}
 0x20c   : > { %1009 = dma.vmem_to_hbm [thread:$0]  (%p1208_p5), %s935_s30, 128, %s937_s2, %s922_s3  }
 0x20d PF: > { %p1015_p4 = scmp.ge.s32.totalorder %s1158_s9, 2  ;;  %s948_s19 = sand.u32 1, %s1146_s6  }
 0x20e   : > { %s949_s20 = scalar_lea.sflag [#allocation3], %s948_s19 }
 0x20f   : > { %p1012_p7 = pnand %p1015_p4, %p1212_p6 }
 0x211   : > { %p1013_p8 = pneg %p1012_p7 }
 0x213   : > { %1141 = dma.done.wait (%p1013_p8), %s949_s20, 128  }
 0x214   : > { %1143 = vsyncadd (%p1013_p8), %s949_s20, 4294967168  ;;  %p11_p9 = scmp.ge.s32.totalorder %s1195_s12, 4   ;;  %s1815_s6 = smov %s1150_s7 }
 0x215   : > { %s1816_s7 = smov %s1154_s8  ;;  %s1817_s8 = smov %s1206_s15 }
 0x216   : > { %s1818_s9 = smov %s1195_s12  ;;  %13 = sbr.rel (!%p11_p9) target bundleno = 3 (0x3), region = 59 }
 0x21b   :  { %955 = vsyncpa [#allocation3], 1 }
 0x21c   :  { %957 = vsyncpa [#allocation3 + $0x1], 1 }

</bundles_post_ra>
